<compile_context>
chip_gen: v7x
topology: tpu7x:2x2x1
jax: 0.10.0
libtpu: 0.0.40
codegen_flags: <defaults>
</compile_context>

<pallas_src>
import numpy as np
import jax
import jax.numpy as jnp
from jax import lax
from jax.experimental import pallas as pl
from jax.experimental.pallas import tpu as pltpu

# ---- synthetic (small) body-model dimensions -------------------------------
V = 512            # template vertices (real SMPL: 6890) — folded away at init
NUM_BETAS = 16     # shape coefficients
J_TOTAL = 52       # total joints in SMPL-H style model
N_JOINTS = 24      # SourceKeyPoints.n_joints
J_PAD = 128        # lane-dense padding of the joint axis for the kernel output
K_AUG = NUM_BETAS + 1   # betas + constant-1 column (joint template folded into the matmul)
TILE_B_MAX = 512   # large batch tile (per review: 256-512 reaches ~85% of HBM roofline)

# deterministic kinematic tree (parent[i] < i, parent[0] = -1)
PARENTS = np.array([-1] + [(i - 1) // 2 for i in range(1, J_TOTAL)], dtype=np.int32)

# ---- static kinematic-tree bookkeeping: depth-order permutation + contiguous levels ----
_DEPTHS = np.zeros(J_TOTAL, dtype=np.int32)
for _i in range(1, J_TOTAL):
    _DEPTHS[_i] = _DEPTHS[PARENTS[_i]] + 1
_PERM = np.argsort(_DEPTHS, kind="stable").astype(np.int32)      # position -> joint
_INV_PERM = np.empty(J_TOTAL, dtype=np.int32)
_INV_PERM[_PERM] = np.arange(J_TOTAL, dtype=np.int32)            # joint -> position
_LEVELS_PERM = []   # (start, count, parent positions) per depth >= 1; contiguous in perm order
for _d in range(1, int(_DEPTHS.max()) + 1):
    _pos = np.nonzero(_DEPTHS[_PERM] == _d)[0]
    _start, _count = int(_pos[0]), int(_pos.size)
    assert np.all(_pos == np.arange(_start, _start + _count))     # contiguity by construction
    _par_pos = _INV_PERM[PARENTS[_PERM[_pos]]]
    _LEVELS_PERM.append((_start, _count, _par_pos))


# ---- Pallas kernel: [betas | 1] -> rest joints (blend shapes + regression + template) ----
def _rest_joints_kernel(betas_ref, jdirs_ref, out_ref):
    # (TILE_B, 17) bf16 @ (17, 3*J_PAD) bf16 on the MXU, f32 accumulate.
    out_ref[...] = jnp.dot(betas_ref[...], jdirs_ref[...],
                           preferred_element_type=jnp.float32)


def rest_joints_pallas(betas, jdirs_aug):
    """betas (B, L) f32 -> rest joint locations (B, J_TOTAL, 3) f32."""
    B = betas.shape[0]
    # Single block for small batches, 512-row tiles (sublane aligned) for large ones.
    if B <= TILE_B_MAX:
        tile = max(8, ((B + 7) // 8) * 8)
    else:
        tile = TILE_B_MAX
    B_pad = ((B + tile - 1) // tile) * tile
    if B_pad != B:
        betas = jnp.pad(betas, ((0, B_pad - B), (0, 0)))
    # Fold the joint template into the matmul: append a constant-1 column (K = 17).
    betas_aug = jnp.concatenate(
        [betas, jnp.ones((B_pad, 1), betas.dtype)], axis=1).astype(jnp.bfloat16)

    num_blocks = B_pad // tile
    out = pl.pallas_call(
        _rest_joints_kernel,
        out_shape=jax.ShapeDtypeStruct((B_pad, 3 * J_PAD), jnp.float32),
        grid=(num_blocks,),
        in_specs=[
            pl.BlockSpec((tile, K_AUG), lambda b: (b, 0)),        # per-step betas tile
            pl.BlockSpec((K_AUG, 3 * J_PAD), lambda b: (0, 0)),   # grid-invariant weights
        ],
        out_specs=pl.BlockSpec((tile, 3 * J_PAD), lambda b: (b, 0)),
        compiler_params=pltpu.CompilerParams(
            dimension_semantics=("parallel",) if num_blocks > 1 else ("arbitrary",)),
    )(betas_aug, jdirs_aug)

    rest = out[:B].reshape(B, 3, J_PAD)[:, :, :J_TOTAL]           # (B, 3, J)
    return jnp.transpose(rest, (0, 2, 1))                         # (B, J, 3)


# ---- small per-joint glue (plain JAX, fused under jit) ----------------------
def batch_rodrigues(rot_vecs):
    """axis-angle (N, 3) -> rotation matrices (N, 3, 3)."""
    eps = 1e-8
    angle = jnp.linalg.norm(rot_vecs + eps, axis=-1, keepdims=True)   # (N, 1)
    rot_dir = rot_vecs / angle
    cos = jnp.cos(angle)[:, :, None]                                  # (N, 1, 1)
    sin = jnp.sin(angle)[:, :, None]
    rx, ry, rz = rot_dir[:, 0], rot_dir[:, 1], rot_dir[:, 2]
    zeros = jnp.zeros_like(rx)
    K = jnp.stack([zeros, -rz, ry, rz, zeros, -rx, -ry, rx, zeros],
                  axis=1).reshape(-1, 3, 3)
    ident = jnp.eye(3, dtype=rot_vecs.dtype)[None]
    return ident + sin * K + (1.0 - cos) * (K @ K)


def batch_rigid_transform(rot_mats, joints):
    """rot_mats (B,J,3,3), joints (B,J,3) -> posed joint locations (B,J,3).

    Composed level-by-level in kinematic-tree depth order: each level is a contiguous
    slice, so every update is a dynamic_update_slice (no scatters); parents are gathered
    with static indices; a single constant-index gather restores original joint order.
    """
    B, J = joints.shape[:2]
    rel = jnp.concatenate(
        [joints[:, :1], joints[:, 1:] - joints[:, PARENTS[1:]]], axis=1)
    # Permute into depth order (static-index gathers).
    rot_p = rot_mats[:, _PERM]
    rel_p = rel[:, _PERM]
    top = jnp.concatenate([rot_p, rel_p[..., None]], axis=-1)            # (B,J,3,4)
    bottom = jnp.broadcast_to(
        jnp.array([0.0, 0.0, 0.0, 1.0], dtype=joints.dtype), (B, J, 1, 4))
    local_T = jnp.concatenate([top, bottom], axis=-2)                    # (B,J,4,4) depth order

    transforms = local_T                                                 # depth-0 root already global
    for start, count, par_pos in _LEVELS_PERM:                           # static levels
        parent_T = transforms[:, par_pos]                                # static-index gather
        composed = jnp.matmul(parent_T, local_T[:, start:start + count]) # (B,|lvl|,4,4)
        transforms = lax.dynamic_update_slice_in_dim(transforms, composed, start, axis=1)
    posed_p = transforms[:, :, :3, 3]                                    # depth order
    return posed_p[:, _INV_PERM]                                         # back to joint order


class BodyModelJax:
    """Synthetic SMPL-H style body model. Only the Jtr path is materialized."""

    def __init__(self, key):
        k1, k2, k3 = jax.random.split(key, 3)
        # deterministic synthetic parameters (this is NOT a checkpoint load)
        self.v_template3 = 0.5 * jax.random.normal(k1, (3, V), jnp.float32)
        self.shapedirs3 = 0.01 * jax.random.normal(k2, (3, NUM_BETAS, V), jnp.float32)
        jreg = jax.nn.softmax(jax.random.normal(k3, (J_TOTAL, V), jnp.float32), axis=-1)
        self.jregT = jnp.transpose(jreg, (1, 0)).astype(jnp.float32)      # (V, J_TOTAL)
        self.parents = PARENTS

        # One-time algebraic fold: V never appears at runtime again, and the joint
        # template is baked into the matmul as an extra K row (driven by a ones column).
        jdirs = jnp.einsum('klv,vj->klj', self.shapedirs3, self.jregT)    # (3, L, J)
        jdirs = jnp.pad(jdirs, ((0, 0), (0, 0), (0, J_PAD - J_TOTAL)))    # (3, L, J_PAD)
        jdirs_flat = jnp.transpose(jdirs, (1, 0, 2)).reshape(NUM_BETAS, 3 * J_PAD)
        jtemp = self.v_template3 @ self.jregT                             # (3, J)
        jtemp = jnp.pad(jtemp, ((0, 0), (0, J_PAD - J_TOTAL)))            # (3, J_PAD)
        jtemp_flat = jtemp.reshape(1, 3 * J_PAD)
        self.jdirs_aug = jnp.concatenate([jdirs_flat, jtemp_flat],
                                         axis=0).astype(jnp.bfloat16)     # (L+1, 3*J_PAD)

        self._jitted_forward = jax.jit(self._forward)

    def _forward(self, root_orient, pose_body, pose_hand, betas, trans):
        B = betas.shape[0]
        # Pallas hot path: folded blend-shapes + joint regression + template (one matmul)
        rest_joints = rest_joints_pallas(betas, self.jdirs_aug)           # (B, J, 3)
        full_pose = jnp.concatenate([root_orient, pose_body, pose_hand], axis=-1)
        rot_mats = batch_rodrigues(full_pose.reshape(-1, 3)).reshape(B, J_TOTAL, 3, 3)
        posed_joints = batch_rigid_transform(rot_mats, rest_joints)
        Jtr = posed_joints + trans[:, None, :]
        # TODO(synk): full LBS vertex skinning (new_body.v) is not materialized; only Jtr
        # is consumed by SourceKeyPoints.forward.
        return Jtr

    def __call__(self, root_orient, pose_body, pose_hand, betas, trans):
        return self._jitted_forward(root_orient, pose_body, pose_hand, betas, trans)


class SourceKeyPoints:
    def __init__(self, bm, n_joints: int = N_JOINTS):
        self.bm = bm
        self.n_joints = n_joints
        # Color('grey').rgb == (128/255,)*3
        self.kpts_colors = np.array([(0.5019607843137255,) * 3 for _ in range(n_joints)])

    def forward(self, body_parms):
        Jtr = self.bm(**body_parms)
        return {'source_kpts': Jtr[:, :self.n_joints],
                'body': Jtr,
                'params': body_parms}


if __name__ == "__main__":
    key = jax.random.PRNGKey(0)
    k_model, k_b, k_ro, k_pb, k_ph, k_t = jax.random.split(key, 6)

    bm = BodyModelJax(k_model)
    source_pts = SourceKeyPoints(bm=bm, n_joints=N_JOINTS)

    B = 2
    body_parms = {
        'root_orient': 0.2 * jax.random.normal(k_ro, (B, 3), jnp.float32),
        'pose_body':   0.2 * jax.random.normal(k_pb, (B, 63), jnp.float32),
        'pose_hand':   0.2 * jax.random.normal(k_ph, (B, 90), jnp.float32),
        'betas':       jax.random.normal(k_b, (B, NUM_BETAS), jnp.float32),
        'trans':       jax.random.normal(k_t, (B, 3), jnp.float32),
    }

    out = source_pts.forward(body_parms)
    src_kpts = jax.block_until_ready(out['source_kpts'])
    assert src_kpts.shape == (B, N_JOINTS, 3) and src_kpts.dtype == jnp.float32
    assert bool(jnp.all(jnp.isfinite(src_kpts)))
    print("KERNEL_OK")
</pallas_src>

<mosaic_0001>
module attributes {stable_mosaic.version = 11 : i64} {
  func.func @_rest_joints_kernel(%arg0: i32, %arg1: memref<8x17xbf16, #tpu.memory_space<vmem>>, %arg2: memref<17x384xbf16, #tpu.memory_space<vmem>>, %arg3: memref<8x384xf32, #tpu.memory_space<vmem>>) attributes {dimension_semantics = [#tpu.dimension_semantics<arbitrary>], iteration_bounds = array<i64: 1>, scalar_prefetch = 0 : i64, scratch_operands = 0 : i64, tpu.core_type = #tpu.core_type<tc>, window_params = [{transform_indices = @transform_0, window_bounds = array<i64: 8, 17>}, {pipeline_mode = #tpu.pipeline_mode<synchronous>, transform_indices = @transform_1, window_bounds = array<i64: 17, 384>}, {transform_indices = @transform_2, window_bounds = array<i64: 8, 384>}]} {
    %c0 = arith.constant 0 : index
    %c0_0 = arith.constant 0 : index
    %0 = vector.load %arg1[%c0, %c0_0] : memref<8x17xbf16, #tpu.memory_space<vmem>>, vector<8x17xbf16>
    %c0_1 = arith.constant 0 : index
    %c0_2 = arith.constant 0 : index
    %1 = vector.load %arg2[%c0_1, %c0_2] : memref<17x384xbf16, #tpu.memory_space<vmem>>, vector<17x384xbf16>
    %cst = arith.constant dense<0.000000e+00> : vector<8x384xf32>
    %2 = tpu.matmul %0, %1, %cst {dimension_numbers = #tpu.dot_dimension_numbers<[1], [0], [0], [1], [0, 0, 1, 1], [], []>} : vector<8x17xbf16>, vector<17x384xbf16>, vector<8x384xf32> -> vector<8x384xf32>
    %c0_3 = arith.constant 0 : index
    %c0_4 = arith.constant 0 : index
    %3 = vector.load %arg3[%c0_3, %c0_4] : memref<8x384xf32, #tpu.memory_space<vmem>>, vector<8x384xf32>
    tpu.vector_store %arg3[%c0_3, %c0_4], %2 {strides = array<i32>} : memref<8x384xf32, #tpu.memory_space<vmem>>, vector<8x384xf32>,
    return
  }
  func.func @transform_0(%arg0: i32) -> (i32, i32) {
    %c0_i32 = arith.constant 0 : i32
    %c0_i32_0 = arith.constant 0 : i32
    return %arg0, %c0_i32 : i32, i32
  }
  func.func @transform_1(%arg0: i32) -> (i32, i32) {
    %c0_i32 = arith.constant 0 : i32
    %c0_i32_0 = arith.constant 0 : i32
    %c0_i32_1 = arith.constant 0 : i32
    return %c0_i32, %c0_i32_0 : i32, i32
  }
  func.func @transform_2(%arg0: i32) -> (i32, i32) {
    %c0_i32 = arith.constant 0 : i32
    %c0_i32_0 = arith.constant 0 : i32
    return %arg0, %c0_i32 : i32, i32
  }
}

</mosaic_0001>

<bundles_post_ra>
// kernel: _forward.1
= control target key start
LH: loop header
LB: loop body
LE: loop exit
PB: predicated region body
PF: predicated region fallthrough
CT: control target
= control target key end

     0   :  { %vm47_vm0 = vcmask 1040384   ;;  %v176_v0 = vmov 0.0   ;;  %v177_v2 = vmov 0   ;;  %vm178_vm1 = vmmov 0   ;;  %s221_s1 = inlined_call_operand.vmem [shape: bf16[17,384], index: 1, kind: input, shape index: {}]   ;;  %s222_s0 = inlined_call_operand.vmem [shape: bf16[8,17], index: 0, kind: input, shape index: {}]   ;;  %s223_s2 = inlined_call_operand.vmem [shape: f32[8,384], index: 2, kind: output, shape index: {}]  }
   0x1   :  { %158 = vmatprep.subr.bf16.mxu1 %v176_v0  ;;  %v169_v1 = vld [vmem:[%s221_s1 + $0x4] ss:$12 sps:$4 sm:$0xff]   ;;  %v49_v3 = vsel %vm47_vm0, 65535, %v177_v2  ;;  %162 = vmatprep.mubr.msk.bf16.mxu1 %vm178_vm1, %v176_v0  ;;  %v171_v4 = vld [vmem:[%s221_s1 + $0x8] ss:$12 sps:$4 sm:$0xff]   ;;  %vm43_vm2 = vcmask 138240  }
   0x2   :  { %91 = vmatprep.mubr.bf16.mxu0 %v177_v2  ;;  %59 = vmatprep.subr.bf16.mxu0 %v169_v1  ;;  %v172_v5 = vld [vmem:[%s221_s1] ss:$12 sps:$4 sm:$0xff]   ;;  %v17_v6 = vld [vmem:[%s221_s1 + $0x18] sm:$0x11] }
   0x3   :  { %159 = vmatpush3.bf16.msra.mxu1 %v171_v4  ;;  %v151_v7 = vcombine.high %v17_v6, %v17_v6  ;;  %v174_v8 = vld [vmem:[%s221_s1 + $0x20] ss:$0 sps:$4 sm:$0x11]   ;;  %v150_v9 = vcombine.low %v17_v6, %v17_v6  ;;  %60 = vmatpush1.bf16.msra.mxu0 %v172_v5 }
   0x4   :  { %160 = vmatprep.subr.bf16.mxu1 %v176_v0  ;;  %v57_v11 = vand.u32 %v174_v8, %v49_v3  ;;  %v12_v13 = vld [vmem:[%s222_s0] sm:$0xf] }
   0x5   :  { %v54_v10 = vand.u32 %v151_v7, %v49_v3  ;;  %v51_v12 = vand.u32 %v150_v9, %v49_v3 }
   0x7   :  { %61 = vmatprep.subr.bf16.mxu0 %v54_v10  ;;  %161 = vmatpush3.bf16.msra.mxu1 %v57_v11 }
   0x8   :  { %62 = vmatpush1.bf16.msra.mxu0 %v51_v12 }
   0xa   :  { %163 = vmatmul.mubr.msk.bf16.vlgmr.msra.gmra.mrb[0].mxu1 %vm43_vm2, %v12_v13 }
   0xb   :  { %153 = vmatmul.mubr.msk.bf16.vlgmr.msra.gmra.mrb[0].mxu0 %vm43_vm2, %v12_v13 }
  0xdd   :  { %v134_v14 = vpop.f32.mrb[0].mxu1 }
  0xde   :  { %142 = vst [vmem:[%s223_s2 + $0x10] sm:$0xff] %v134_v14  ;;  %v93_v15 = vpop.f32.mrb[0].mxu0  ;;  %v164_v16 = vpop.f32.mrb[1].mxu1 }
  0xdf   :  { %140 = vst [vmem:[%s223_s2] sm:$0xff] %v93_v15  ;;  %v95_v17 = vpop.f32.mrb[1].mxu0  ;;  %v137_v18 = vpop.f32.mrb[2].mxu1 }
  0xe0   :  { %141 = vst [vmem:[%s223_s2 + $0x8] sm:$0xff] %v95_v17  ;;  %v97_v19 = vpop.f32.mrb[2].mxu0  ;;  %v165_v20 = vpop.f32.mrb[3].mxu1 }
  0xe1   :  { %v98_v21 = vpop.f32.mrb[3].mxu0 }

</bundles_post_ra>
